<compile_context>
chip_gen: v5e
topology: v5e:2x2
jax: 0.10.0
libtpu: 0.0.40
codegen_flags: <defaults>
</compile_context>

<pallas_src>
import functools

import jax
import jax.numpy as jnp
from jax.experimental import pallas as pl
from jax.experimental.pallas import tpu as pltpu

LANES = 128                         # lane (fast) axis; full vreg width
TARGET_BLOCK_BYTES = 2 * 1024 * 1024  # ~2 MiB per input block


def _add_kernel(x_ref, y_ref, o_ref):
    o_ref[...] = x_ref[...] + y_ref[...]


def _sublane_multiple(itemsize: int) -> int:
    # f32 -> 8, bf16/f16 -> 16, int8/fp8 -> 32 (packed-dtype sublane tiling)
    return max(8, 32 // itemsize)


@jax.jit
def pallas_add(a: jax.Array, b: jax.Array) -> jax.Array:
    assert a.shape == b.shape, "Tensors must have the same shape."
    assert a.dtype == b.dtype, "Tensors must have the same dtype."
    orig_shape = a.shape
    dtype = a.dtype
    n = a.size
    if n == 0:
        return a + b

    itemsize = jnp.dtype(dtype).itemsize
    sub_mult = _sublane_multiple(itemsize)

    # Flatten; pad only when numel is not a multiple of the lane width.
    pad = (-n) % LANES
    a_flat = a.reshape(-1)
    b_flat = b.reshape(-1)
    if pad:
        a_flat = jnp.pad(a_flat, (0, pad))
        b_flat = jnp.pad(b_flat, (0, pad))
    n_pad = n + pad
    rows = n_pad // LANES

    # Block rows: ~TARGET_BLOCK_BYTES per input, multiple of the sublane tile,
    # capped at the full row count (block == full dim is always legal).
    rows_block = TARGET_BLOCK_BYTES // (LANES * itemsize)
    rows_block = max(sub_mult, (rows_block // sub_mult) * sub_mult)
    if rows_block >= rows:
        rows_block = rows

    grid = (pl.cdiv(rows, rows_block),)

    a2 = a_flat.reshape(rows, LANES)
    b2 = b_flat.reshape(rows, LANES)

    spec = pl.BlockSpec((rows_block, LANES), lambda i: (i, 0))

    out2 = pl.pallas_call(
        _add_kernel,
        out_shape=jax.ShapeDtypeStruct((rows, LANES), dtype),
        grid_spec=pltpu.PrefetchScalarGridSpec(
            num_scalar_prefetch=0,
            grid=grid,
            in_specs=[spec, spec],
            out_specs=spec,
        ),
        compiler_params=pltpu.CompilerParams(
            dimension_semantics=("parallel",),
            # 6 x block (2 in + 1 out, double-buffered) = ~12 MiB; raise the
            # v5e default (16 MiB) headroom explicitly, stays far under v7x's
            # 64 MiB physical VMEM.
            vmem_limit_bytes=32 * 1024 * 1024,
        ),
        cost_estimate=pl.CostEstimate(
            flops=n_pad,
            transcendentals=0,
            bytes_accessed=3 * n_pad * itemsize,
        ),
    )(a2, b2)

    out_flat = out2.reshape(-1)
    if pad:
        out_flat = out_flat[:n]
    return out_flat.reshape(orig_shape)


class ModelNew:
    """JAX/Pallas equivalent of the PyTorch ModelNew (Triton elementwise add)."""

    def __init__(self) -> None:
        pass

    def __call__(self, a, b):
        return pallas_add(a, b)


if __name__ == "__main__":
    key = jax.random.PRNGKey(0)
    k1, k2, k3, k4 = jax.random.split(key, 4)
    model = ModelNew()

    # Case 1: lane-divisible numel (fast path, no pad/slice).
    shape = (2, 4, 16, 16)
    a = jax.random.normal(k1, shape, dtype=jnp.float32)
    b = jax.random.normal(k2, shape, dtype=jnp.float32)
    out = jax.block_until_ready(model(a, b))
    expected = a + b
    assert out.shape == expected.shape and out.dtype == expected.dtype
    assert jnp.allclose(out, expected, atol=1e-6), "mismatch vs reference (case 1)"

    # Case 2: non-divisible numel (padded path).
    shape2 = (3, 5, 7)
    a2 = jax.random.normal(k3, shape2, dtype=jnp.float32)
    b2 = jax.random.normal(k4, shape2, dtype=jnp.float32)
    out2 = jax.block_until_ready(model(a2, b2))
    expected2 = a2 + b2
    assert out2.shape == expected2.shape
    assert jnp.allclose(out2, expected2, atol=1e-6), "mismatch vs reference (case 2)"

    print("KERNEL_OK")
</pallas_src>

<mosaic_0001>
module attributes {stable_mosaic.version = 11 : i64} {
  func.func @_add_kernel(%arg0: i32, %arg1: memref<16x128xf32, #tpu.memory_space<vmem>>, %arg2: memref<16x128xf32, #tpu.memory_space<vmem>>, %arg3: memref<16x128xf32, #tpu.memory_space<vmem>>) attributes {dimension_semantics = [#tpu.dimension_semantics<parallel>], iteration_bounds = array<i64: 1>, scalar_prefetch = 0 : i64, scratch_operands = 0 : i64, tpu.core_type = #tpu.core_type<tc>, window_params = [{transform_indices = @transform_0, window_bounds = array<i64: 16, 128>}, {transform_indices = @transform_1, window_bounds = array<i64: 16, 128>}, {transform_indices = @transform_2, window_bounds = array<i64: 16, 128>}]} {
    %c0 = arith.constant 0 : index
    %c0_0 = arith.constant 0 : index
    %0 = vector.load %arg1[%c0, %c0_0] : memref<16x128xf32, #tpu.memory_space<vmem>>, vector<16x128xf32>
    %c0_1 = arith.constant 0 : index
    %c0_2 = arith.constant 0 : index
    %1 = vector.load %arg2[%c0_1, %c0_2] : memref<16x128xf32, #tpu.memory_space<vmem>>, vector<16x128xf32>
    %2 = arith.addf %0, %1 : vector<16x128xf32>
    %c0_3 = arith.constant 0 : index
    %c0_4 = arith.constant 0 : index
    %3 = vector.load %arg3[%c0_3, %c0_4] : memref<16x128xf32, #tpu.memory_space<vmem>>, vector<16x128xf32>
    tpu.vector_store %arg3[%c0_3, %c0_4], %2 {strides = array<i32>} : memref<16x128xf32, #tpu.memory_space<vmem>>, vector<16x128xf32>,
    return
  }
  func.func @transform_0(%arg0: i32) -> (i32, i32) {
    %c0_i32 = arith.constant 0 : i32
    %c0_i32_0 = arith.constant 0 : i32
    return %arg0, %c0_i32 : i32, i32
  }
  func.func @transform_1(%arg0: i32) -> (i32, i32) {
    %c0_i32 = arith.constant 0 : i32
    %c0_i32_0 = arith.constant 0 : i32
    return %arg0, %c0_i32 : i32, i32
  }
  func.func @transform_2(%arg0: i32) -> (i32, i32) {
    %c0_i32 = arith.constant 0 : i32
    %c0_i32_0 = arith.constant 0 : i32
    return %arg0, %c0_i32 : i32, i32
  }
}

</mosaic_0001>

<bundles_post_ra>
// kernel: pallas_add.1
= control target key start
LH: loop header
LB: loop body
LE: loop exit
PB: predicated region body
PF: predicated region fallthrough
CT: control target
= control target key end

     0   :  { %s56_s0 = inlined_call_operand.vmem [shape: f32[16,128], index: 0, kind: input, shape index: {}]   ;;  %s57_s1 = inlined_call_operand.vmem [shape: f32[16,128], index: 1, kind: input, shape index: {}]   ;;  %s58_s2 = inlined_call_operand.vmem [shape: f32[16,128], index: 2, kind: output, shape index: {}]  }
   0x1   :  { %v11_v0 = vld [vmem:[%s56_s0] sm:$0xff]  ;;  %v12_v2 = vld [vmem:[%s56_s0 + $0x8] sm:$0xff] }
   0x2   :  { %v13_v1 = vld [vmem:[%s57_s1] sm:$0xff]  ;;  %v14_v4 = vld [vmem:[%s57_s1 + $0x8] sm:$0xff] }
   0x3   :  { %v15_v3 = vadd.f32 %v13_v1, %v11_v0  ;;  %v16_v5 = vadd.f32 %v14_v4, %v12_v2 }
   0x5   :  { %17 = vst [vmem:[%s58_s2] sm:$0xff] %v15_v3 }
   0x6   :  { %18 = vst [vmem:[%s58_s2 + $0x8] sm:$0xff] %v16_v5 }

</bundles_post_ra>
